<compile_context>
chip_gen: v5e
topology: v5e:2x2
jax: 0.10.0
libtpu: 0.0.40
codegen_flags: <defaults>
</compile_context>

<pallas_src>
import jax
import jax.numpy as jnp
from jax.experimental import pallas as pl
from jax.experimental.pallas import tpu as pltpu


def _round_up(n, m):
    return ((n + m - 1) // m) * m


def _cdiv(a, b):
    return (a + b - 1) // b


def _actor_kernel(ma_ref, x_ref, w1_ref, b1_ref, w2_ref, b2_ref, w3_ref,
                  b3_ref, o_ref):
    maxaction = ma_ref[0, 0]                       # scalar from SMEM
    dt = w1_ref.dtype                              # matmul input dtype

    # layer 1: (TM, S) @ (S, W) + (1, W) -> relu   (f32 accumulate)
    h1 = jnp.dot(x_ref[...].astype(dt), w1_ref[...],
                 preferred_element_type=jnp.float32)
    h1 = jnp.maximum(h1 + b1_ref[...], 0.0)

    # layer 2: (TM, W) @ (W, H) + (1, H) -> relu
    h2 = jnp.dot(h1.astype(w2_ref.dtype), w2_ref[...],
                 preferred_element_type=jnp.float32)
    h2 = jnp.maximum(h2 + b2_ref[...], 0.0)

    # layer 3: (TM, H) @ (H, A) + (1, A) -> tanh * maxaction
    h3 = jnp.dot(h2.astype(w3_ref.dtype), w3_ref[...],
                 preferred_element_type=jnp.float32)
    o_ref[...] = (jnp.tanh(h3 + b3_ref[...]) * maxaction).astype(o_ref.dtype)


def actor_forward(state, params, maxaction, *, tm=512):
    """state: (B, state_dim) f32.  params: dict of W1,b1,W2,b2,W3,b3.

    Weights are stored (in_features, out_features); biases are (1, out).
    Weights may be float32 or bfloat16; accumulation is always float32.
    """
    w1, b1 = params["W1"], params["b1"]
    w2, b2 = params["W2"], params["b2"]
    w3, b3 = params["W3"], params["b3"]

    B, S = state.shape
    W = w1.shape[1]
    H = w2.shape[1]          # 300 in the original module
    A = w3.shape[1]

    # Batch tile: multiple of 8 sublanes, no larger than needed, and split in
    # two when the grid would otherwise be a single step (v7x megacore).
    TM = max(8, min(_round_up(tm, 8), _round_up(B, 8)))
    if _cdiv(B, TM) < 2 and B > 8:
        TM = _round_up(_cdiv(B, 2), 8)
    grid = (_cdiv(B, TM),)

    ma = jnp.full((1, 1), maxaction, jnp.float32)

    weight_bytes = (w1.size * w1.dtype.itemsize +
                    w2.size * w2.dtype.itemsize +
                    w3.size * w3.dtype.itemsize +
                    (b1.size + b2.size + b3.size) * 4)
    cost = pl.CostEstimate(
        flops=2 * B * (S * W + W * H + H * A),
        transcendentals=B * A,
        bytes_accessed=B * S * state.dtype.itemsize + weight_bytes + B * A * 4,
    )

    out = pl.pallas_call(
        _actor_kernel,
        out_shape=jax.ShapeDtypeStruct((B, A), jnp.float32),
        grid=grid,
        in_specs=[
            # maxaction scalar, whole (1,1) array in SMEM (untiled)
            pl.BlockSpec(memory_space=pltpu.MemorySpace.SMEM),
            # activations: tiled over batch -> pipelined (last dim = full S)
            pl.BlockSpec((TM, S), lambda i: (i, 0)),
            # weights / biases: constant block index -> VMEM-resident,
            # all at their true (unpadded) sizes.
            pl.BlockSpec((S, W), lambda i: (0, 0)),
            pl.BlockSpec((1, W), lambda i: (0, 0)),
            pl.BlockSpec((W, H), lambda i: (0, 0)),
            pl.BlockSpec((1, H), lambda i: (0, 0)),
            pl.BlockSpec((H, A), lambda i: (0, 0)),
            pl.BlockSpec((1, A), lambda i: (0, 0)),
        ],
        out_specs=pl.BlockSpec((TM, A), lambda i: (i, 0)),
        compiler_params=pltpu.CompilerParams(
            dimension_semantics=("parallel",)),
        cost_estimate=cost,
    )(ma, state, w1, b1, w2, b2, w3, b3)

    return out


def init_actor_params(key, state_dim, net_width, action_dim,
                      dtype=jnp.float32):
    """nn.Linear-style U(-1/sqrt(fan_in), +1/sqrt(fan_in)) init.

    Weights are stored (in, out) = transpose of PyTorch's (out, in) storage;
    weights take `dtype` (f32 or bf16), biases stay f32.
    """
    def linear(k, fan_in, fan_out):
        kw, kb = jax.random.split(k)
        bound = 1.0 / jnp.sqrt(fan_in)
        w = jax.random.uniform(kw, (fan_in, fan_out), jnp.float32,
                               -bound, bound).astype(dtype)
        b = jax.random.uniform(kb, (1, fan_out), jnp.float32, -bound, bound)
        return w, b

    k1, k2, k3 = jax.random.split(key, 3)
    W1, b1 = linear(k1, state_dim, net_width)
    W2, b2 = linear(k2, net_width, 300)
    W3, b3 = linear(k3, 300, action_dim)
    return {"W1": W1, "b1": b1, "W2": W2, "b2": b2, "W3": W3, "b3": b3}


def actor_reference(state, params, maxaction):
    f32 = lambda a: a.astype(jnp.float32)
    a = jnp.maximum(state @ f32(params["W1"]) + params["b1"], 0.0)
    a = jnp.maximum(a @ f32(params["W2"]) + params["b2"], 0.0)
    return jnp.tanh(a @ f32(params["W3"]) + params["b3"]) * maxaction


if __name__ == "__main__":
    # small shapes consistent with the module
    batch, state_dim, net_width, action_dim = 8, 16, 32, 4
    maxaction = 2.0

    key = jax.random.PRNGKey(0)
    k_params, k_state = jax.random.split(key)
    state = jax.random.normal(k_state, (batch, state_dim), jnp.float32)

    # f32 weights: exact match vs reference
    params32 = init_actor_params(k_params, state_dim, net_width, action_dim,
                                 dtype=jnp.float32)
    out32 = jax.block_until_ready(actor_forward(state, params32, maxaction))
    ref32 = actor_reference(state, params32, maxaction)
    assert out32.shape == (batch, action_dim)
    assert jnp.allclose(out32, ref32, atol=1e-5, rtol=1e-5), "f32 mismatch"

    # non-divisible batch: exercises the cdiv grid, the partial last tile,
    # and the megacore tile split.
    state_big = jax.random.normal(jax.random.PRNGKey(1), (300, state_dim),
                                  jnp.float32)
    out_big = jax.block_until_ready(
        actor_forward(state_big, params32, maxaction))
    ref_big = actor_reference(state_big, params32, maxaction)
    assert out_big.shape == (300, action_dim)
    assert jnp.allclose(out_big, ref_big, atol=1e-5, rtol=1e-5), \
        "partial-tile mismatch"

    # bf16 weights (MXU-native on v6e/v7x), f32 accumulate: loose tolerance
    # (inputs/activations are intentionally quantized to bf16 in-kernel).
    params16 = init_actor_params(k_params, state_dim, net_width, action_dim,
                                 dtype=jnp.bfloat16)
    out16 = jax.block_until_ready(actor_forward(state, params16, maxaction))
    ref16 = actor_reference(state, params16, maxaction)
    assert jnp.allclose(out16, ref16, atol=2e-2, rtol=2e-2), "bf16 mismatch"

    print("KERNEL_OK")
</pallas_src>

<mosaic_0001>
module attributes {stable_mosaic.version = 11 : i64} {
  func.func @_actor_kernel(%arg0: i32, %arg1: memref<1x1xf32, #tpu.memory_space<smem>>, %arg2: memref<8x16xf32, #tpu.memory_space<vmem>>, %arg3: memref<16x32xf32, #tpu.memory_space<vmem>>, %arg4: memref<1x32xf32, #tpu.memory_space<vmem>>, %arg5: memref<32x300xf32, #tpu.memory_space<vmem>>, %arg6: memref<1x300xf32, #tpu.memory_space<vmem>>, %arg7: memref<300x4xf32, #tpu.memory_space<vmem>>, %arg8: memref<1x4xf32, #tpu.memory_space<vmem>>, %arg9: memref<8x4xf32, #tpu.memory_space<vmem>>) attributes {dimension_semantics = [#tpu.dimension_semantics<parallel>], iteration_bounds = array<i64: 1>, scalar_prefetch = 0 : i64, scratch_operands = 0 : i64, tpu.core_type = #tpu.core_type<tc>, window_params = [{transform_indices = @transform_0, window_bounds = array<i64: 1, 1>}, {transform_indices = @transform_1, window_bounds = array<i64: 8, 16>}, {pipeline_mode = #tpu.pipeline_mode<synchronous>, transform_indices = @transform_2, window_bounds = array<i64: 16, 32>}, {pipeline_mode = #tpu.pipeline_mode<synchronous>, transform_indices = @transform_3, window_bounds = array<i64: 1, 32>}, {pipeline_mode = #tpu.pipeline_mode<synchronous>, transform_indices = @transform_4, window_bounds = array<i64: 32, 300>}, {pipeline_mode = #tpu.pipeline_mode<synchronous>, transform_indices = @transform_5, window_bounds = array<i64: 1, 300>}, {pipeline_mode = #tpu.pipeline_mode<synchronous>, transform_indices = @transform_6, window_bounds = array<i64: 300, 4>}, {pipeline_mode = #tpu.pipeline_mode<synchronous>, transform_indices = @transform_7, window_bounds = array<i64: 1, 4>}, {transform_indices = @transform_8, window_bounds = array<i64: 8, 4>}]} {
    %c0 = arith.constant 0 : index
    %c0_0 = arith.constant 0 : index
    %0 = memref.load %arg1[%c0, %c0_0] : memref<1x1xf32, #tpu.memory_space<smem>>
    %c0_1 = arith.constant 0 : index
    %c0_2 = arith.constant 0 : index
    %1 = vector.load %arg2[%c0_1, %c0_2] : memref<8x16xf32, #tpu.memory_space<vmem>>, vector<8x16xf32>
    %c0_3 = arith.constant 0 : index
    %c0_4 = arith.constant 0 : index
    %2 = vector.load %arg3[%c0_3, %c0_4] : memref<16x32xf32, #tpu.memory_space<vmem>>, vector<16x32xf32>
    %cst = arith.constant dense<0.000000e+00> : vector<8x32xf32>
    %3 = tpu.matmul %1, %2, %cst {dimension_numbers = #tpu.dot_dimension_numbers<[1], [0], [0], [1], [0, 0, 1, 1], [], []>} : vector<8x16xf32>, vector<16x32xf32>, vector<8x32xf32> -> vector<8x32xf32>
    %c0_5 = arith.constant 0 : index
    %c0_6 = arith.constant 0 : index
    %4 = vector.load %arg4[%c0_5, %c0_6] : memref<1x32xf32, #tpu.memory_space<vmem>>, vector<1x32xf32>
    %5 = vector.broadcast %4 : vector<1x32xf32> to vector<8x32xf32>
    %6 = arith.addf %3, %5 : vector<8x32xf32>
    %cst_7 = arith.constant 0.000000e+00 : f32
    %7 = vector.broadcast %cst_7 : f32 to vector<8x32xf32>
    %8 = arith.maximumf %6, %7 : vector<8x32xf32>
    %c0_8 = arith.constant 0 : index
    %c0_9 = arith.constant 0 : index
    %9 = vector.load %arg5[%c0_8, %c0_9] : memref<32x300xf32, #tpu.memory_space<vmem>>, vector<32x300xf32>
    %cst_10 = arith.constant dense<0.000000e+00> : vector<8x300xf32>
    %10 = tpu.matmul %8, %9, %cst_10 {dimension_numbers = #tpu.dot_dimension_numbers<[1], [0], [0], [1], [0, 0, 1, 1], [], []>} : vector<8x32xf32>, vector<32x300xf32>, vector<8x300xf32> -> vector<8x300xf32>
    %c0_11 = arith.constant 0 : index
    %c0_12 = arith.constant 0 : index
    %11 = vector.load %arg6[%c0_11, %c0_12] : memref<1x300xf32, #tpu.memory_space<vmem>>, vector<1x300xf32>
    %12 = vector.broadcast %11 : vector<1x300xf32> to vector<8x300xf32>
    %13 = arith.addf %10, %12 : vector<8x300xf32>
    %cst_13 = arith.constant 0.000000e+00 : f32
    %14 = vector.broadcast %cst_13 : f32 to vector<8x300xf32>
    %15 = arith.maximumf %13, %14 : vector<8x300xf32>
    %c0_14 = arith.constant 0 : index
    %c0_15 = arith.constant 0 : index
    %16 = vector.load %arg7[%c0_14, %c0_15] : memref<300x4xf32, #tpu.memory_space<vmem>>, vector<300x4xf32>
    %cst_16 = arith.constant dense<0.000000e+00> : vector<8x4xf32>
    %17 = tpu.matmul %15, %16, %cst_16 {dimension_numbers = #tpu.dot_dimension_numbers<[1], [0], [0], [1], [0, 0, 1, 1], [], []>} : vector<8x300xf32>, vector<300x4xf32>, vector<8x4xf32> -> vector<8x4xf32>
    %c0_17 = arith.constant 0 : index
    %c0_18 = arith.constant 0 : index
    %18 = vector.load %arg8[%c0_17, %c0_18] : memref<1x4xf32, #tpu.memory_space<vmem>>, vector<1x4xf32>
    %19 = vector.broadcast %18 : vector<1x4xf32> to vector<8x4xf32>
    %20 = arith.addf %17, %19 : vector<8x4xf32>
    %21 = math.tanh %20 : vector<8x4xf32>
    %22 = vector.broadcast %0 : f32 to vector<8x4xf32>
    %23 = arith.mulf %21, %22 : vector<8x4xf32>
    %c0_19 = arith.constant 0 : index
    %c0_20 = arith.constant 0 : index
    %24 = vector.load %arg9[%c0_19, %c0_20] : memref<8x4xf32, #tpu.memory_space<vmem>>, vector<8x4xf32>
    tpu.vector_store %arg9[%c0_19, %c0_20], %23 {strides = array<i32>} : memref<8x4xf32, #tpu.memory_space<vmem>>, vector<8x4xf32>,
    return
  }
  func.func @transform_0(%arg0: i32) -> (i32, i32) {
    %c0_i32 = arith.constant 0 : i32
    %c0_i32_0 = arith.constant 0 : i32
    %c0_i32_1 = arith.constant 0 : i32
    return %c0_i32, %c0_i32_0 : i32, i32
  }
  func.func @transform_1(%arg0: i32) -> (i32, i32) {
    %c0_i32 = arith.constant 0 : i32
    %c0_i32_0 = arith.constant 0 : i32
    return %arg0, %c0_i32 : i32, i32
  }
  func.func @transform_2(%arg0: i32) -> (i32, i32) {
    %c0_i32 = arith.constant 0 : i32
    %c0_i32_0 = arith.constant 0 : i32
    %c0_i32_1 = arith.constant 0 : i32
    return %c0_i32, %c0_i32_0 : i32, i32
  }
  func.func @transform_3(%arg0: i32) -> (i32, i32) {
    %c0_i32 = arith.constant 0 : i32
    %c0_i32_0 = arith.constant 0 : i32
    %c0_i32_1 = arith.constant 0 : i32
    return %c0_i32, %c0_i32_0 : i32, i32
  }
  func.func @transform_4(%arg0: i32) -> (i32, i32) {
    %c0_i32 = arith.constant 0 : i32
    %c0_i32_0 = arith.constant 0 : i32
    %c0_i32_1 = arith.constant 0 : i32
    return %c0_i32, %c0_i32_0 : i32, i32
  }
  func.func @transform_5(%arg0: i32) -> (i32, i32) {
    %c0_i32 = arith.constant 0 : i32
    %c0_i32_0 = arith.constant 0 : i32
    %c0_i32_1 = arith.constant 0 : i32
    return %c0_i32, %c0_i32_0 : i32, i32
  }
  func.func @transform_6(%arg0: i32) -> (i32, i32) {
    %c0_i32 = arith.constant 0 : i32
    %c0_i32_0 = arith.constant 0 : i32
    %c0_i32_1 = arith.constant 0 : i32
    return %c0_i32, %c0_i32_0 : i32, i32
  }
  func.func @transform_7(%arg0: i32) -> (i32, i32) {
    %c0_i32 = arith.constant 0 : i32
    %c0_i32_0 = arith.constant 0 : i32
    %c0_i32_1 = arith.constant 0 : i32
    return %c0_i32, %c0_i32_0 : i32, i32
  }
  func.func @transform_8(%arg0: i32) -> (i32, i32) {
    %c0_i32 = arith.constant 0 : i32
    %c0_i32_0 = arith.constant 0 : i32
    return %arg0, %c0_i32 : i32, i32
  }
}

</mosaic_0001>

<bundles_post_ra>
// kernel: tpu_custom_call.1
= control target key start
LH: loop header
LB: loop body
LE: loop exit
PB: predicated region body
PF: predicated region fallthrough
CT: control target
= control target key end

     0   :  { %vm38_vm0 = vcmask 130048   ;;  %vm83_vm1 = vcmask 261120   ;;  %vm196_vm2 = vcmask 1043456   ;;  %vm192_vm3 = vcmask 359424   ;;  %s498_s2 = inlined_call_operand.vmem [shape: f32[16,32], index: 2, kind: input, shape index: {}]   ;;  %s499_s1 = inlined_call_operand.vmem [shape: f32[8,16], index: 1, kind: input, shape index: {}]   ;;  %s500_s4 = inlined_call_operand.vmem [shape: f32[32,300], index: 4, kind: input, shape index: {}]   ;;  %s501_s3 = inlined_call_operand.vmem [shape: f32[1,32], index: 3, kind: input, shape index: {}]   ;;  %s502_s6 = inlined_call_operand.vmem [shape: f32[300,4], index: 6, kind: input, shape index: {}]   ;;  %s503_s7 = inlined_call_operand.vmem [shape: f32[1,4], index: 7, kind: input, shape index: {}]   ;;  %s504_s5 = inlined_call_operand.vmem [shape: f32[1,300], index: 5, kind: input, shape index: {}]   ;;  %s505_s0 = inlined_call_operand.<no memory space> [shape: f32[1,1], index: 0, kind: input, shape index: {}]   ;;  %s506_s8 = inlined_call_operand.vmem [shape: f32[8,4], index: 8, kind: output, shape index: {}]  }
   0x1   :  { %v33_v0 = vld [vmem:[%s498_s2 + $0x8] sm:$0xff]  ;;  %v32_v1 = vld [vmem:[%s498_s2] sm:$0xff]  ;;  %v73_v3 = vld [vmem:[%s500_s4 + $0x50] sm:$0xff]  ;;  %vm263_vm4 = vcmask 31744  }
   0x2   :  { %56 = vmatpush.msra.mxu3 %v33_v0  ;;  %v31_v2 = vld [vmem:[%s499_s1] sm:$0xff]  ;;  %v72_v4 = vld [vmem:[%s500_s4 + $0x48] sm:$0xff]  ;;  %119 = vmatpush.msra.mxu2 %v73_v3  ;;  %v69_v5 = vld [vmem:[%s500_s4 + $0x30] sm:$0xff] }
   0x3   :  { %v70_v6 = vld [vmem:[%s500_s4 + $0x38] sm:$0xff]  ;;  %v67_v8 = vld [vmem:[%s500_s4 + $0x20] sm:$0xff]  ;;  %v64_v10 = vld [vmem:[%s500_s4 + $0x8] sm:$0xff] }
   0x4   :  { %57 = vmatpush.msra.mxu3 %v32_v1  ;;  %120 = vmatpush.msra.mxu2 %v70_v6  ;;  %v66_v7 = vld [vmem:[%s500_s4 + $0x18] sm:$0xff]  ;;  %v63_v9 = vld [vmem:[%s500_s4] sm:$0xff]  ;;  %v68_v13 = vld [vmem:[%s500_s4 + $0x28] sm:$0xff] }
   0x5   :  { %269 = vmatmul.msk.f32.vlgmr.msra.gmra.mxu3 %vm38_vm0, %v31_v2  ;;  %v74_v11 = vld [vmem:[%s500_s4 + $0x58] sm:$0xff]  ;;  %v71_v12 = vld [vmem:[%s500_s4 + $0x40] sm:$0xff]  ;;  %v65_v14 = vld [vmem:[%s500_s4 + $0x10] sm:$0xff] }
   0x6   :  { %99 = vmatpush.msrb.mxu3 %v72_v4  ;;  %121 = vmatpush.msra.mxu2 %v67_v8  ;;  %v165_v15 = vld [vmem:[%s502_s6 + $0x78] sm:$0xff]  ;;  %v164_v17 = vld [vmem:[%s502_s6 + $0x70] sm:$0xff]  ;;  %v163_v19 = vld [vmem:[%s502_s6 + $0x68] sm:$0xff] }
   0x7   :  { %v181_v16 = vld [vmem:[%s502_s6 + $0xf8] sm:$0xff]  ;;  %200 = vmatpush.msra.mxu0 %v165_v15  ;;  %v180_v18 = vld [vmem:[%s502_s6 + $0xf0] sm:$0xff]  ;;  %v179_v20 = vld [vmem:[%s502_s6 + $0xe8] sm:$0xff] }
   0x8   :  { %100 = vmatpush.msrb.mxu3 %v69_v5  ;;  %122 = vmatpush.msra.mxu2 %v64_v10  ;;  %v162_v21 = vld [vmem:[%s502_s6 + $0x60] sm:$0xff]  ;;  %v161_v23 = vld [vmem:[%s502_s6 + $0x58] sm:$0xff]  ;;  %v160_v25 = vld [vmem:[%s502_s6 + $0x50] sm:$0xff] }
   0x9   :  { %220 = vmatpush.msra.mxu1 %v181_v16  ;;  %201 = vmatpush.msra.mxu0 %v164_v17  ;;  %v178_v22 = vld [vmem:[%s502_s6 + $0xe0] sm:$0xff]  ;;  %v177_v24 = vld [vmem:[%s502_s6 + $0xd8] sm:$0xff]  ;;  %v176_v26 = vld [vmem:[%s502_s6 + $0xd0] sm:$0xff] }
   0xa   :  { %101 = vmatpush.msrb.mxu3 %v66_v7  ;;  %v159_v27 = vld [vmem:[%s502_s6 + $0x48] sm:$0xff]  ;;  %v158_v29 = vld [vmem:[%s502_s6 + $0x40] sm:$0xff]  ;;  %v157_v31 = vld [vmem:[%s502_s6 + $0x38] sm:$0xff] }
   0xb   :  { %221 = vmatpush.msra.mxu1 %v180_v18  ;;  %202 = vmatpush.msra.mxu0 %v163_v19  ;;  %v175_v28 = vld [vmem:[%s502_s6 + $0xc8] sm:$0xff]  ;;  %v174_v30 = vld [vmem:[%s502_s6 + $0xc0] sm:$0xff]  ;;  %v173_v32 = vld [vmem:[%s502_s6 + $0xb8] sm:$0xff] }
   0xc   :  { %102 = vmatpush.msrb.mxu3 %v63_v9  ;;  %v275_v33 = vld [vmem:[%s501_s3] ss:$0 sm:$0xff]  ;;  %v156_v34 = vld [vmem:[%s502_s6 + $0x30] sm:$0xff]  ;;  %v155_v36 = vld [vmem:[%s502_s6 + $0x28] sm:$0xff] }
   0xd   :  { %222 = vmatpush.msra.mxu1 %v179_v20  ;;  %203 = vmatpush.msra.mxu0 %v162_v21  ;;  %v172_v35 = vld [vmem:[%s502_s6 + $0xb0] sm:$0xff]  ;;  %v171_v37 = vld [vmem:[%s502_s6 + $0xa8] sm:$0xff]  ;;  %v154_v40 = vld [vmem:[%s502_s6 + $0x20] sm:$0xff] }
   0xe   :  { %139 = vmatpush.msra.mxu3 %v74_v11  ;;  %v170_v41 = vld [vmem:[%s502_s6 + $0xa0] sm:$0xff]  ;;  %v153_v43 = vld [vmem:[%s502_s6 + $0x18] sm:$0xff]  ;;  %v152_v45 = vld [vmem:[%s502_s6 + $0x10] sm:$0xff] }
   0xf   :  { %223 = vmatpush.msra.mxu1 %v178_v22  ;;  %204 = vmatpush.msra.mxu0 %v161_v23  ;;  %v169_v44 = vld [vmem:[%s502_s6 + $0x98] sm:$0xff]  ;;  %v168_v46 = vld [vmem:[%s502_s6 + $0x90] sm:$0xff]  ;;  %v151_v47 = vld [vmem:[%s502_s6 + $0x8] sm:$0xff] }
  0x10   :  { %140 = vmatpush.msra.mxu3 %v71_v12  ;;  %v167_v48 = vld [vmem:[%s502_s6 + $0x88] sm:$0xff]  ;;  %v150_v50 = vld [vmem:[%s502_s6] sm:$0xff]  ;;  %v185_v53 = vld [vmem:[%s502_s6 + $0x118] sm:$0xff] }
  0x11   :  { %224 = vmatpush.msra.mxu1 %v177_v24  ;;  %205 = vmatpush.msra.mxu0 %v160_v25  ;;  %v187_v49 = vld [vmem:[%s502_s6 + $0x128] sm:$0xf]  ;;  %v166_v51 = vld [vmem:[%s502_s6 + $0x80] sm:$0xff]  ;;  %v184_v54 = vld [vmem:[%s502_s6 + $0x110] sm:$0xff] }
  0x12   :  { %141 = vmatpush.msra.mxu3 %v68_v13  ;;  %273 = vmatpush.msk.msrb.mxu2 %vm196_vm2, %v187_v49  ;;  %v186_v52 = vld [vmem:[%s502_s6 + $0x120] sm:$0xff]  ;;  %v183_v55 = vld [vmem:[%s502_s6 + $0x108] sm:$0xff]  ;;  %v261_v13 = vstv %s505_s0 }
  0x13   :  { %225 = vmatpush.msra.mxu1 %v176_v26  ;;  %206 = vmatpush.msra.mxu0 %v159_v27  ;;  %v182_v56 = vld [vmem:[%s502_s6 + $0x100] sm:$0xff] }
  0x14   :  { %142 = vmatpush.msra.mxu3 %v65_v14  ;;  %251 = vmatpush.msrb.mxu2 %v186_v52  ;;  %v75_v57 = vld [vmem:[%s504_s5] sm:$0x7] }
  0x15   :  { %226 = vmatpush.msra.mxu1 %v175_v28  ;;  %207 = vmatpush.msra.mxu0 %v158_v29  ;;  %v77_v58 = vperm.slane %v75_v57, 0  ;;  %v78_v59 = vperm.slane %v75_v57, 1  ;;  %v79_v2 = vperm.slane %v75_v57, 2  ;;  %v276_v6 = vld [vmem:[%s503_s7] ss:$0 sm:$0xff] }
  0x16   :  { %252 = vmatpush.msrb.mxu2 %v185_v53 }
  0x17   :  { %227 = vmatpush.msra.mxu1 %v174_v30  ;;  %208 = vmatpush.msra.mxu0 %v157_v31 }
  0x18   :  { %253 = vmatpush.msrb.mxu2 %v184_v54 }
  0x19   :  { %228 = vmatpush.msra.mxu1 %v173_v32  ;;  %209 = vmatpush.msra.mxu0 %v156_v34 }
  0x1a   :  { %254 = vmatpush.msrb.mxu2 %v183_v55 }
  0x1b   :  { %229 = vmatpush.msra.mxu1 %v172_v35  ;;  %210 = vmatpush.msra.mxu0 %v155_v36 }
  0x1c   :  { %255 = vmatpush.msrb.mxu2 %v182_v56 }
  0x1d   :  { %230 = vmatpush.msra.mxu1 %v171_v37  ;;  %211 = vmatpush.msra.mxu0 %v154_v40 }
  0x1f   :  { %231 = vmatpush.msra.mxu1 %v170_v41  ;;  %212 = vmatpush.msra.mxu0 %v153_v43 }
  0x21   :  { %232 = vmatpush.msra.mxu1 %v169_v44  ;;  %213 = vmatpush.msra.mxu0 %v152_v45 }
  0x23   :  { %233 = vmatpush.msra.mxu1 %v168_v46  ;;  %214 = vmatpush.msra.mxu0 %v151_v47 }
  0x25   :  { %234 = vmatpush.msra.mxu1 %v167_v48  ;;  %215 = vmatpush.msra.mxu0 %v150_v50 }
  0x27   :  { %235 = vmatpush.msra.mxu1 %v166_v51 }
  0x88   :  { %v59_v38 = vpop.f32.mrf.mxu3 }
  0x89   :  { %v60_v39 = vadd.f32 %v275_v33, %v59_v38 }
  0x8b   :  { %v62_v42 = vmax.f32 %v60_v39, 0.0 }
  0x8d   :  { %270 = vmatmul.msk.f32.vlgmr.msrb.gmra.mxu3 %vm83_vm1, %v62_v42  ;;  %271 = vmatmul.msk.f32.vlgmr.msra.gmra.mxu2 %vm83_vm1, %v62_v42 }
  0x95   :  { %272 = vmatmul.msk.f32.vlgmr.msra.gmra.mxu3 %vm83_vm1, %v62_v42 }
 0x110   :  { %v104_v60 = vpop.f32.mrf.mxu3  ;;  %v124_v61 = vpop.f32.mrf.mxu2 }
 0x111   :  { %v105_v62 = vadd.f32 %v104_v60, %v77_v58  ;;  %v125_v63 = vadd.f32 %v124_v61, %v78_v59 }
 0x113   :  { %v147_v0 = vmax.f32 %v105_v62, 0.0  ;;  %v148_v1 = vmax.f32 %v125_v63, 0.0 }
 0x115   :  { %216 = vmatmul.f32.vlgmr.msra.gmra.mxu0 %v147_v0  ;;  %236 = vmatmul.f32.vlgmr.msra.gmra.mxu1 %v148_v1 }
 0x118   :  { %v144_v3 = vpop.f32.mrf.mxu3 }
 0x119   :  { %v145_v4 = vadd.f32 %v144_v3, %v79_v2 }
 0x11b   :  { %v149_v5 = vmax.f32 %v145_v4, 0.0 }
 0x11d   :  { %274 = vmatmul.msk.f32.vlgmr.msrb.gmra.mxu2 %vm192_vm3, %v149_v5 }
 0x192   :  { %v217_v7 = vpop.f32.mrf.mxu0  ;;  %v237_v9 = vpop.f32.mrf.mxu1 }
 0x193   :  { %v218_v8 = vadd.f32 %v276_v6, %v217_v7 }
 0x195   :  { %v238_v10 = vadd.f32 %v237_v9, %v218_v8 }
 0x1a0   :  { %v257_v11 = vpop.f32.mrf.mxu2 }
 0x1a1   :  { %v258_v12 = vadd.f32 %v257_v11, %v238_v10 }
 0x1a3   :  { %277 = vtanh.f32 %v258_v12 }
 0x1a9   :  { %v278_v14 = vpop.eup %277 }
 0x1aa   :  { %v262_v15 = vmul.f32 %v278_v14, %v261_v13 }
 0x1ac   :  { %264 = vst.msk [vmem:[%s506_s8] sm:$0xff] %vm263_vm4, %v262_v15 }

</bundles_post_ra>
